<compile_context>
chip_gen: v5e
topology: v5e:2x2
jax: 0.10.0
libtpu: 0.0.40
codegen_flags: <defaults>
</compile_context>

<pallas_src>
import functools

import jax
import jax.numpy as jnp
from jax.experimental import pallas as pl
from jax.experimental.pallas import tpu as pltpu


def _focal_loss_kernel(logits_ref, tgt_ref, out_ref, *, alpha, gamma,
                       total_n, tile_n):
    i = pl.program_id(0)

    logits = logits_ref[...].astype(jnp.float32)          # (tile_n, C)
    tgt = tgt_ref[...]                                     # (tile_n, 1) int32

    # Numerically-stable log-sum-exp over the class (lane) dim.
    m = jnp.max(logits, axis=-1, keepdims=True)            # (tile_n, 1)
    lse = m + jnp.log(jnp.sum(jnp.exp(logits - m), axis=-1, keepdims=True))

    # Gather the logit at the target class via one-hot select (VPU-friendly).
    cls_idx = jax.lax.broadcasted_iota(jnp.int32, logits.shape, 1)
    tgt_logit = jnp.sum(jnp.where(cls_idx == tgt, logits, 0.0),
                        axis=-1, keepdims=True)            # (tile_n, 1)

    # CE >= 0 mathematically; clamp to kill tiny negative rounding noise.
    ce = jnp.maximum(lse - tgt_logit, 0.0)
    pt = jnp.exp(-ce)
    base = jnp.maximum(1.0 - pt, 0.0)                      # safe pow base

    g = float(gamma)
    if g == 0.0:
        w = jnp.ones_like(base)
    elif g.is_integer() and 1.0 <= g <= 8.0:
        # Small integer gamma: repeated multiply (pure VPU, no EUP pow).
        w = base
        for _ in range(int(g) - 1):
            w = w * base
    else:
        w = base ** g                                      # lax.pow, clamped base

    focal = jnp.float32(alpha) * w * ce                    # (tile_n, 1)

    # Mask rows of the (possibly ragged) last tile.
    row_idx = i * tile_n + jax.lax.broadcasted_iota(jnp.int32, (tile_n, 1), 0)
    out_ref[...] = jnp.where(row_idx < total_n, focal, 0.0)


def _choose_tile_n(n, c, itemsize):
    """Largest row tile that keeps the double-buffered pipeline ~20 MiB."""
    c_pad = ((c + 127) // 128) * 128
    # Per row in VMEM: logits + lane-padded int32 target + lane-padded f32 output.
    per_row_bytes = c_pad * itemsize + 2 * 128 * 4
    budget = 20 * 1024 * 1024
    tile = budget // (2 * per_row_bytes)                   # 2x for double buffering
    tile = max(8, min(int(tile), 2048))
    tile = (tile // 8) * 8
    n_pad = ((n + 7) // 8) * 8
    return max(8, min(tile, n_pad))


def focal_loss(logits, targets, *, alpha=1.0, gamma=2.0, reduction="mean",
               tile_n=None):
    """Focal loss matching the PyTorch module (default reduction='mean')."""
    n, c = logits.shape
    itemsize = jnp.dtype(logits.dtype).itemsize
    if tile_n is None:
        tile_n = _choose_tile_n(n, c, itemsize)
    tile_n = max(8, (int(tile_n) // 8) * 8)

    num_tiles = pl.cdiv(n, tile_n)
    n_pad = num_tiles * tile_n

    tgt2d = targets.astype(jnp.int32).reshape(n, 1)

    kernel = functools.partial(
        _focal_loss_kernel,
        alpha=float(alpha), gamma=float(gamma), total_n=n, tile_n=tile_n)

    # VMEM actually needed (double-buffered blocks), with headroom; capped so it
    # stays comfortably inside v7x's 64 MiB physical VMEM.
    c_pad = ((c + 127) // 128) * 128
    vmem_need = 2 * tile_n * (c_pad * itemsize + 2 * 128 * 4)
    vmem_limit = int(min(max(2 * vmem_need + (4 << 20), 16 << 20), 40 << 20))

    cost = pl.CostEstimate(
        flops=6 * n * c,
        transcendentals=n * c + 2 * n,
        bytes_accessed=n * c * itemsize + n * 4 + n_pad * 4)

    per_row = pl.pallas_call(
        kernel,
        out_shape=jax.ShapeDtypeStruct((n_pad, 1), jnp.float32),
        grid_spec=pltpu.PrefetchScalarGridSpec(
            num_scalar_prefetch=0,
            grid=(num_tiles,),
            in_specs=[
                pl.BlockSpec((tile_n, c), lambda i: (i, 0)),
                pl.BlockSpec((tile_n, 1), lambda i: (i, 0)),
            ],
            out_specs=pl.BlockSpec((tile_n, 1), lambda i: (i, 0)),
        ),
        compiler_params=pltpu.CompilerParams(
            dimension_semantics=("parallel",),
            vmem_limit_bytes=vmem_limit),
        cost_estimate=cost,
    )(logits, tgt2d)

    if reduction == "mean":
        return jnp.sum(per_row) / jnp.float32(n)
    elif reduction == "sum":
        return jnp.sum(per_row)
    else:  # 'none'
        return per_row[:n, 0]


def _focal_loss_ref(logits, targets, alpha=1.0, gamma=2.0):
    logits = logits.astype(jnp.float32)
    lse = jax.nn.logsumexp(logits, axis=-1)
    tgt_logit = jnp.take_along_axis(
        logits, targets[:, None].astype(jnp.int32), axis=-1)[:, 0]
    ce = lse - tgt_logit
    pt = jnp.exp(-ce)
    return jnp.mean(alpha * (1.0 - pt) ** gamma * ce)


if __name__ == "__main__":
    key = jax.random.PRNGKey(0)
    k1, k2 = jax.random.split(key)

    # Primary small-shape test: a typical (N, C) classification head.
    N, C = 16, 32
    logits = jax.random.normal(k1, (N, C), dtype=jnp.float32)
    targets = jax.random.randint(k2, (N,), 0, C, dtype=jnp.int32)

    out = jax.block_until_ready(focal_loss(logits, targets, alpha=1.0, gamma=2.0))
    ref = _focal_loss_ref(logits, targets, 1.0, 2.0)
    assert jnp.allclose(out, ref, rtol=1e-5, atol=1e-6), (out, ref)

    # Ragged N (not a multiple of the tile) + multi-tile grid: exercises masking.
    k3, k4 = jax.random.split(k2)
    N2, C2 = 100, 160
    logits2 = jax.random.normal(k3, (N2, C2), dtype=jnp.float32)
    targets2 = jax.random.randint(k4, (N2,), 0, C2, dtype=jnp.int32)
    out2 = jax.block_until_ready(focal_loss(logits2, targets2, tile_n=32))
    ref2 = _focal_loss_ref(logits2, targets2, 1.0, 2.0)
    assert jnp.allclose(out2, ref2, rtol=1e-5, atol=1e-6), (out2, ref2)

    # bf16 logits path (half the HBM read traffic; f32 math inside the kernel).
    out3 = jax.block_until_ready(
        focal_loss(logits2.astype(jnp.bfloat16), targets2))
    ref3 = _focal_loss_ref(logits2.astype(jnp.bfloat16), targets2, 1.0, 2.0)
    assert jnp.allclose(out3, ref3, rtol=2e-2, atol=2e-3), (out3, ref3)

    print("KERNEL_OK")
</pallas_src>

<mosaic_0001>
module attributes {stable_mosaic.version = 11 : i64} {
  func.func @_focal_loss_kernel(%arg0: i32, %arg1: memref<16x32xf32, #tpu.memory_space<vmem>>, %arg2: memref<16x1xi32, #tpu.memory_space<vmem>>, %arg3: memref<16x1xf32, #tpu.memory_space<vmem>>) attributes {dimension_semantics = [#tpu.dimension_semantics<parallel>], iteration_bounds = array<i64: 1>, scalar_prefetch = 0 : i64, scratch_operands = 0 : i64, tpu.core_type = #tpu.core_type<tc>, window_params = [{transform_indices = @transform_0, window_bounds = array<i64: 16, 32>}, {transform_indices = @transform_1, window_bounds = array<i64: 16, 1>}, {transform_indices = @transform_2, window_bounds = array<i64: 16, 1>}]} {
    %c0 = arith.constant 0 : index
    %c0_0 = arith.constant 0 : index
    %0 = vector.load %arg1[%c0, %c0_0] : memref<16x32xf32, #tpu.memory_space<vmem>>, vector<16x32xf32>
    %c0_1 = arith.constant 0 : index
    %c0_2 = arith.constant 0 : index
    %1 = vector.load %arg2[%c0_1, %c0_2] : memref<16x1xi32, #tpu.memory_space<vmem>>, vector<16x1xi32>
    %cst = arith.constant dense<0xFF800000> : vector<16xf32>
    %2 = vector.multi_reduction <maximumf>, %0, %cst [1] : vector<16x32xf32> to vector<16xf32>
    %3 = vector.shape_cast %2 : vector<16xf32> to vector<16x1xf32>
    %4 = vector.broadcast %3 : vector<16x1xf32> to vector<16x32xf32>
    %5 = arith.subf %0, %4 : vector<16x32xf32>
    %6 = math.exp %5 : vector<16x32xf32>
    %cst_3 = arith.constant dense<0.000000e+00> : vector<16xf32>
    %7 = vector.multi_reduction <add>, %6, %cst_3 [1] : vector<16x32xf32> to vector<16xf32>
    %8 = vector.shape_cast %7 : vector<16xf32> to vector<16x1xf32>
    %9 = math.log %8 : vector<16x1xf32>
    %10 = arith.addf %3, %9 : vector<16x1xf32>
    %11 = tpu.iota {dimensions = array<i32: 1>} : vector<16x32xi32>
    %12 = vector.broadcast %1 : vector<16x1xi32> to vector<16x32xi32>
    %13 = arith.cmpi eq, %11, %12 : vector<16x32xi32>
    %cst_4 = arith.constant 0.000000e+00 : f32
    %14 = vector.broadcast %cst_4 : f32 to vector<16x32xf32>
    %15 = arith.select %13, %0, %14 : vector<16x32xi1>, vector<16x32xf32>
    %cst_5 = arith.constant dense<0.000000e+00> : vector<16xf32>
    %16 = vector.multi_reduction <add>, %15, %cst_5 [1] : vector<16x32xf32> to vector<16xf32>
    %17 = vector.shape_cast %16 : vector<16xf32> to vector<16x1xf32>
    %18 = arith.subf %10, %17 : vector<16x1xf32>
    %cst_6 = arith.constant 0.000000e+00 : f32
    %19 = vector.broadcast %cst_6 : f32 to vector<16x1xf32>
    %20 = arith.maximumf %18, %19 : vector<16x1xf32>
    %cst_7 = arith.constant 0.000000e+00 : f32
    %21 = vector.broadcast %cst_7 : f32 to vector<16x1xf32>
    %22 = arith.subf %21, %20 : vector<16x1xf32>
    %23 = math.exp %22 : vector<16x1xf32>
    %cst_8 = arith.constant 1.000000e+00 : f32
    %24 = vector.broadcast %cst_8 : f32 to vector<16x1xf32>
    %25 = arith.subf %24, %23 : vector<16x1xf32>
    %cst_9 = arith.constant 0.000000e+00 : f32
    %26 = vector.broadcast %cst_9 : f32 to vector<16x1xf32>
    %27 = arith.maximumf %25, %26 : vector<16x1xf32>
    %28 = arith.mulf %27, %27 : vector<16x1xf32>
    %cst_10 = arith.constant 1.000000e+00 : f32
    %29 = vector.broadcast %cst_10 : f32 to vector<16x1xf32>
    %30 = arith.mulf %29, %28 : vector<16x1xf32>
    %31 = arith.mulf %30, %20 : vector<16x1xf32>
    %c16_i32 = arith.constant 16 : i32
    %32 = arith.muli %arg0, %c16_i32 : i32
    %33 = tpu.iota {dimensions = array<i32: 0>} : vector<16x1xi32>
    %34 = vector.broadcast %32 : i32 to vector<16x1xi32>
    %35 = arith.addi %34, %33 : vector<16x1xi32>
    %c16_i32_11 = arith.constant 16 : i32
    %36 = vector.broadcast %c16_i32_11 : i32 to vector<16x1xi32>
    %37 = arith.cmpi slt, %35, %36 : vector<16x1xi32>
    %cst_12 = arith.constant 0.000000e+00 : f32
    %38 = vector.broadcast %cst_12 : f32 to vector<16x1xf32>
    %39 = arith.select %37, %31, %38 : vector<16x1xi1>, vector<16x1xf32>
    %c0_13 = arith.constant 0 : index
    %c0_14 = arith.constant 0 : index
    %40 = vector.load %arg3[%c0_13, %c0_14] : memref<16x1xf32, #tpu.memory_space<vmem>>, vector<16x1xf32>
    tpu.vector_store %arg3[%c0_13, %c0_14], %39 {strides = array<i32>} : memref<16x1xf32, #tpu.memory_space<vmem>>, vector<16x1xf32>,
    return
  }
  func.func @transform_0(%arg0: i32) -> (i32, i32) {
    %c0_i32 = arith.constant 0 : i32
    %c0_i32_0 = arith.constant 0 : i32
    return %arg0, %c0_i32 : i32, i32
  }
  func.func @transform_1(%arg0: i32) -> (i32, i32) {
    %c0_i32 = arith.constant 0 : i32
    %c0_i32_0 = arith.constant 0 : i32
    return %arg0, %c0_i32 : i32, i32
  }
  func.func @transform_2(%arg0: i32) -> (i32, i32) {
    %c0_i32 = arith.constant 0 : i32
    %c0_i32_0 = arith.constant 0 : i32
    return %arg0, %c0_i32 : i32, i32
  }
}

</mosaic_0001>

<bundles_post_ra>
// kernel: tpu_custom_call.1
= control target key start
LH: loop header
LB: loop body
LE: loop exit
PB: predicated region body
PF: predicated region fallthrough
CT: control target
= control target key end

     0   :  { %vm15_vm0 = vcmask 261120   ;;  %v109_v1 = vmov 0   ;;  %v40_v7 = vlaneseq  ;;  %vm87_vm3 = vcmask 7168   ;;  %s149_s0 = inlined_call_operand.vmem [shape: f32[16,32], index: 0, kind: input, shape index: {}]   ;;  %s150_s1 = inlined_call_operand.vmem [shape: s32[16,1], index: 1, kind: input, shape index: {}]   ;;  %s151_s2 = inlined_call_operand.vmem [shape: f32[16,1], index: 2, kind: output, shape index: {}]  }
   0x1   :  { %v11_v0 = vld [vmem:[%s149_s0] sm:$0xff]  ;;  %95 = vset.pattern.permute.xlu1 %v109_v1  ;;  %96 = vset.pattern.permute.xlu0 %v109_v1  ;;  %v12_v4 = vld [vmem:[%s149_s0 + $0x8] sm:$0xff] }
   0x2   :  { %v13_v2 = vld [vmem:[%s150_s1] sm:$0xff]  ;;  %v16_v3 = vsel %vm15_vm0, %v11_v0, -inf  ;;  %v14_v5 = vld [vmem:[%s150_s1 + $0x8] sm:$0xff]  ;;  %v19_v6 = vsel %vm15_vm0, %v12_v4, -inf  ;;  %v41_v8 = vand.u32 127, %v40_v7 }
   0x3   :  { %43 = vperm.xlu1 %95, %v13_v2   ;;  %17 = vmax.xlane.f32.xlu0 %v16_v3 }
   0xb   :  { %46 = vperm.xlu1 %95, %v14_v5   ;;  %20 = vmax.xlane.f32.xlu0 %v19_v6 }
  0x75   :  { %v44_v9 = vpop.permute.xlu1 %43 }
  0x76   :  { %vm48_vm1 = vcmp.eq.s32.totalorder %v41_v8, %v44_v9  ;;  %v18_v10 = vpop.xlane.xlu0 %17 }
  0x77   :  { %v50_v11 = vsel %vm48_vm1, %v11_v0, 0.0  ;;  %v22_v12 = vsub.f32 %v11_v0, %v18_v10 }
  0x78   :  { %v52_v13 = vsel %vm15_vm0, %v50_v11, 0.0 }
  0x79   :  { %53 = vadd.xlane.f32.xlu0 %v52_v13  ;;  %v24_v14 = vmul.f32 1.442695, %v22_v12 }
  0x7b   :  { %97 = vpow2.f32 %v24_v14 }
  0x7d   :  { %v47_v15 = vpop.permute.xlu1 %46 }
  0x7e   :  { %vm49_vm2 = vcmp.eq.s32.totalorder %v41_v8, %v47_v15  ;;  %v21_v16 = vpop.xlane.xlu0 %20 }
  0x7f   :  { %v51_v17 = vsel %vm49_vm2, %v12_v4, 0.0  ;;  %v23_v18 = vsub.f32 %v12_v4, %v21_v16 }
  0x80   :  { %v55_v19 = vsel %vm15_vm0, %v51_v17, 0.0 }
  0x81   :  { %56 = vadd.xlane.f32.xlu1 %v55_v19  ;;  %v98_v20 = vpop.eup %97  ;;  %v26_v21 = vmul.f32 1.442695, %v23_v18 }
  0x82   :  { %v28_v22 = vsel %vm15_vm0, %v98_v20, 0.0 }
  0x83   :  { %99 = vpow2.f32 %v26_v21  ;;  %29 = vadd.xlane.f32.xlu2 %v28_v22 }
  0x89   :  { %v100_v23 = vpop.eup %99 }
  0x8a   :  { %v31_v24 = vsel %vm15_vm0, %v100_v23, 0.0 }
  0x8b   :  { %32 = vadd.xlane.f32.xlu2 %v31_v24 }
  0xec   :  { %v54_v29 = vpop.xlane.xlu0 %53 }
  0xf4   :  { %v57_v38 = vpop.xlane.xlu1 %56 }
  0xf6   :  { %v30_v25 = vpop.xlane.xlu2 %29 }
  0xf7   :  { %101 = vlog2.f32 %v30_v25 }
  0xfd   :  { %v102_v26 = vpop.eup %101 }
  0xfe   :  { %v35_v27 = vmul.f32 0.6931472, %v102_v26  ;;  %v33_v28 = vpop.xlane.xlu2 %32 }
  0xff   :  { %103 = vlog2.f32 %v33_v28 }
 0x100   :  { %v38_v30 = vadd.f32 %v35_v27, %v18_v10 }
 0x102   :  { %v58_v31 = vsub.f32 %v38_v30, %v54_v29 }
 0x104   :  { %v60_v32 = vmax.f32 %v58_v31, 0.0 }
 0x105   :  { %v104_v33 = vpop.eup %103 }
 0x106   :  { %v37_v34 = vmul.f32 0.6931472, %v104_v33  ;;  %v62_v35 = vsub.f32 0.0, %v60_v32 }
 0x108   :  { %v39_v36 = vadd.f32 %v37_v34, %v21_v16  ;;  %v64_v37 = vmul.f32 1.442695, %v62_v35 }
 0x10a   :  { %v59_v39 = vsub.f32 %v39_v36, %v57_v38  ;;  %105 = vpow2.f32 %v64_v37 }
 0x10c   :  { %v61_v40 = vmax.f32 %v59_v39, 0.0 }
 0x10e   :  { %v63_v41 = vsub.f32 0.0, %v61_v40 }
 0x110   :  { %v106_v42 = vpop.eup %105  ;;  %v66_v43 = vmul.f32 1.442695, %v63_v41 }
 0x111   :  { %v68_v44 = vsub.f32 1.0, %v106_v42 }
 0x112   :  { %107 = vpow2.f32 %v66_v43 }
 0x113   :  { %v70_v45 = vmax.f32 %v68_v44, 0.0 }
 0x115   :  { %v72_v46 = vmul.f32 %v70_v45, %v70_v45 }
 0x117   :  { %v74_v47 = vmul.f32 %v72_v46, %v60_v32 }
 0x118   :  { %v108_v48 = vpop.eup %107 }
 0x119   :  { %v69_v49 = vsub.f32 1.0, %v108_v48  ;;  %88 = vst.msk [vmem:[%s151_s2] sm:$0xff] %vm87_vm3, %v74_v47 }
 0x11b   :  { %v71_v50 = vmax.f32 %v69_v49, 0.0 }
 0x11d   :  { %v73_v51 = vmul.f32 %v71_v50, %v71_v50 }
 0x11f   :  { %v75_v52 = vmul.f32 %v73_v51, %v61_v40 }
 0x121   :  { %89 = vst.msk [vmem:[%s151_s2 + $0x8] sm:$0xff] %vm87_vm3, %v75_v52 }

</bundles_post_ra>
